<compile_context>
chip_gen: v7x
topology: tpu7x:2x2x1
jax: 0.10.0
libtpu: 0.0.40
codegen_flags: <defaults>
</compile_context>

<pallas_src>
import functools

import jax
import jax.numpy as jnp
from jax import lax
from jax.experimental import pallas as pl
from jax.experimental.pallas import tpu as pltpu


def _round_up(x, m):
    return ((x + m - 1) // m) * m


def _gating_kernel(e_ref, w_ref, o_ref):
    # e_ref: (tile_b, D)   w_ref: (E_pad, D)   o_ref: (tile_b, E_pad)
    # Contract on D of both operands (PyTorch Linear weight layout -> no wrapper transpose).
    y = lax.dot_general(
        e_ref[...],
        w_ref[...],
        dimension_numbers=(((1,), (1,)), ((), ())),
        preferred_element_type=jnp.float32,
    )
    o_ref[...] = jnp.maximum(y, 0.0).astype(o_ref.dtype)


def _choose_tile_b(B, D, E_pad, itemsize,
                   max_tile_b=512, vmem_budget_bytes=24 * 1024 * 1024):
    """Largest batch tile (multiple of 16, <= max_tile_b) fitting the VMEM budget."""
    w_bytes = 2 * E_pad * D * itemsize                    # double-buffered (invariant) weight
    per_row = 2 * D * itemsize + 2 * E_pad * itemsize     # dbl-buffered activation + output rows
    avail = max(vmem_budget_bytes - w_bytes, 16 * per_row)
    tb = min(max_tile_b, avail // per_row, _round_up(B, 16))
    tb = max(16, (tb // 16) * 16)                         # multiple of 16: bf16/f32 sublane safe
    return int(tb)


@functools.partial(jax.jit, static_argnames=("max_tile_b",))
def multi_headed_sparse_gating_network(e, weight, *, max_tile_b=512):
    """relu(e @ weight.T)  with  e: [..., D],  weight: [E, D]  (PyTorch nn.Linear layout)."""
    orig_shape = e.shape
    D = orig_shape[-1]
    E, D2 = weight.shape
    assert D == D2, "embedding_dim mismatch"

    e2 = e.reshape(-1, D)
    B = e2.shape[0]

    # Match operand dtypes (accumulation is always f32 inside the kernel).
    w = weight.astype(e2.dtype)

    # Lane-dense output: pad num_experts to a multiple of 128 (zero rows -> relu(0)=0,
    # sliced off below).
    E_pad = _round_up(E, 128)
    if E_pad != E:
        w = jnp.pad(w, ((0, E_pad - E), (0, 0)))

    itemsize = jnp.dtype(e2.dtype).itemsize
    tile_b = _choose_tile_b(B, D, E_pad, itemsize, max_tile_b=max_tile_b)
    grid = (pl.cdiv(B, tile_b),)

    cost = pl.CostEstimate(
        flops=2 * B * D * E_pad,
        transcendentals=0,
        bytes_accessed=B * D * itemsize + E_pad * D * itemsize + B * E_pad * itemsize,
    )

    out = pl.pallas_call(
        _gating_kernel,
        out_shape=jax.ShapeDtypeStruct((B, E_pad), e2.dtype),
        grid_spec=pltpu.PrefetchScalarGridSpec(
            num_scalar_prefetch=0,
            grid=grid,
            in_specs=[
                pl.BlockSpec((tile_b, D), lambda i: (i, 0)),   # batch-tiled activations
                pl.BlockSpec((E_pad, D), lambda i: (0, 0)),    # weight resident across steps
            ],
            out_specs=pl.BlockSpec((tile_b, E_pad), lambda i: (i, 0)),
        ),
        compiler_params=pltpu.CompilerParams(
            dimension_semantics=("parallel",),                 # batch steps split across v7x TCs
            vmem_limit_bytes=40 * 1024 * 1024,
        ),
        cost_estimate=cost,
    )(e2, w)

    if E_pad != E:
        out = out[:, :E]
    return out.reshape(*orig_shape[:-1], E)


if __name__ == "__main__":
    key = jax.random.PRNGKey(0)
    k_e, k_w, k_e2 = jax.random.split(key, 3)

    # Small shapes consistent with the module: batch=16, embedding_dim=32, num_experts=16.
    B, D, E = 16, 32, 16
    bound = 1.0 / (D ** 0.5)
    e = jax.random.normal(k_e, (B, D), dtype=jnp.float32)
    # PyTorch nn.Linear(D, E).weight layout -> [E, D]
    weight = jax.random.uniform(k_w, (E, D), dtype=jnp.float32, minval=-bound, maxval=bound)

    # f32 path
    out = jax.block_until_ready(multi_headed_sparse_gating_network(e, weight))
    ref = jnp.maximum(e @ weight.T, 0.0)
    assert out.shape == (B, E)
    assert jnp.allclose(out, ref, atol=1e-4, rtol=1e-4), "f32 mismatch vs reference"

    # bf16 inputs (recommended on v6e/v7x for HBM-bound gating); f32 accumulation inside.
    e_bf = e.astype(jnp.bfloat16)
    w_bf = weight.astype(jnp.bfloat16)
    out_bf = jax.block_until_ready(multi_headed_sparse_gating_network(e_bf, w_bf))
    ref_bf = jnp.maximum(e_bf.astype(jnp.float32) @ w_bf.astype(jnp.float32).T, 0.0)
    assert out_bf.shape == (B, E)
    assert jnp.allclose(out_bf.astype(jnp.float32), ref_bf, atol=2e-2, rtol=2e-2), \
        "bf16 mismatch vs reference"

    # Non-divisible batch (multi-step grid + masked tail tile).
    B2 = 600
    e_tail = jax.random.normal(k_e2, (B2, D), dtype=jnp.float32)
    out_tail = jax.block_until_ready(multi_headed_sparse_gating_network(e_tail, weight))
    ref_tail = jnp.maximum(e_tail @ weight.T, 0.0)
    assert out_tail.shape == (B2, E)
    assert jnp.allclose(out_tail, ref_tail, atol=1e-4, rtol=1e-4), "tail mismatch vs reference"

    print("KERNEL_OK")
</pallas_src>

<mosaic_0001>
module attributes {stable_mosaic.version = 11 : i64} {
  func.func @_gating_kernel(%arg0: i32, %arg1: memref<16x32xf32, #tpu.memory_space<vmem>>, %arg2: memref<128x32xf32, #tpu.memory_space<vmem>>, %arg3: memref<16x128xf32, #tpu.memory_space<vmem>>) attributes {dimension_semantics = [#tpu.dimension_semantics<parallel>], iteration_bounds = array<i64: 1>, scalar_prefetch = 0 : i64, scratch_operands = 0 : i64, tpu.core_type = #tpu.core_type<tc>, window_params = [{transform_indices = @transform_0, window_bounds = array<i64: 16, 32>}, {pipeline_mode = #tpu.pipeline_mode<synchronous>, transform_indices = @transform_1, window_bounds = array<i64: 128, 32>}, {transform_indices = @transform_2, window_bounds = array<i64: 16, 128>}]} {
    %c0 = arith.constant 0 : index
    %c0_0 = arith.constant 0 : index
    %0 = vector.load %arg1[%c0, %c0_0] : memref<16x32xf32, #tpu.memory_space<vmem>>, vector<16x32xf32>
    %c0_1 = arith.constant 0 : index
    %c0_2 = arith.constant 0 : index
    %1 = vector.load %arg2[%c0_1, %c0_2] : memref<128x32xf32, #tpu.memory_space<vmem>>, vector<128x32xf32>
    %cst = arith.constant dense<0.000000e+00> : vector<16x128xf32>
    %2 = tpu.matmul %0, %1, %cst {dimension_numbers = #tpu.dot_dimension_numbers<[1], [1], [0], [0], [0, 0, 1, 0], [], []>} : vector<16x32xf32>, vector<128x32xf32>, vector<16x128xf32> -> vector<16x128xf32>
    %cst_3 = arith.constant 0.000000e+00 : f32
    %3 = vector.broadcast %cst_3 : f32 to vector<16x128xf32>
    %4 = arith.maximumf %2, %3 : vector<16x128xf32>
    %c0_4 = arith.constant 0 : index
    %c0_5 = arith.constant 0 : index
    %5 = vector.load %arg3[%c0_4, %c0_5] : memref<16x128xf32, #tpu.memory_space<vmem>>, vector<16x128xf32>
    tpu.vector_store %arg3[%c0_4, %c0_5], %4 {strides = array<i32>} : memref<16x128xf32, #tpu.memory_space<vmem>>, vector<16x128xf32>,
    return
  }
  func.func @transform_0(%arg0: i32) -> (i32, i32) {
    %c0_i32 = arith.constant 0 : i32
    %c0_i32_0 = arith.constant 0 : i32
    return %arg0, %c0_i32 : i32, i32
  }
  func.func @transform_1(%arg0: i32) -> (i32, i32) {
    %c0_i32 = arith.constant 0 : i32
    %c0_i32_0 = arith.constant 0 : i32
    %c0_i32_1 = arith.constant 0 : i32
    return %c0_i32, %c0_i32_0 : i32, i32
  }
  func.func @transform_2(%arg0: i32) -> (i32, i32) {
    %c0_i32 = arith.constant 0 : i32
    %c0_i32_0 = arith.constant 0 : i32
    return %arg0, %c0_i32 : i32, i32
  }
}

</mosaic_0001>

<bundles_post_ra>
// kernel: multi_headed_sparse_gating_network.1
= control target key start
LH: loop header
LB: loop body
LE: loop exit
PB: predicated region body
PF: predicated region fallthrough
CT: control target
= control target key end

     0   :  { %vm30_vm0 = vcmask 261120   ;;  %s450_s0 = inlined_call_operand.vmem [shape: f32[16,32], index: 0, kind: input, shape index: {}]   ;;  %s451_s1 = inlined_call_operand.vmem [shape: f32[128,32], index: 1, kind: input, shape index: {}]   ;;  %s452_s2 = inlined_call_operand.hbm [shape: f32[16,128], index: 2, kind: output, shape index: {}]  }
   0x1   :  { %v14_v0 = vld [vmem:[%s451_s1] sm:$0xff]  ;;  %v15_v1 = vld [vmem:[%s451_s1 + $0x8] sm:$0xff]  ;;  %v16_v2 = vld [vmem:[%s451_s1 + $0x10] sm:$0xff] }
   0x2   :  { %v251_v3 = vpack.c.bf16 %v15_v1, %v14_v0  ;;  %vm355_vm1 = vmpackc.low %vm30_vm0, %vm30_vm0  ;;  %v17_v5 = vld [vmem:[%s451_s1 + $0x18] sm:$0xff]  ;;  %v12_v7 = vld [vmem:[%s450_s0] sm:$0xff] }
   0x3   :  { %v257_v6 = vpack.c.bf16 %v17_v5, %v16_v2  ;;  %v18_v8 = vld [vmem:[%s451_s1 + $0x20] sm:$0xff]  ;;  %v19_v9 = vld [vmem:[%s451_s1 + $0x28] sm:$0xff]  ;;  %248 = vmatprep.mubr.msk.f32.mxu0 %vm30_vm0, %v12_v7 }
   0x4   :  { %253 = vmatprep.subr.msk.bf16.mxu0 %vm355_vm1, %v251_v3 }
   0x5   :  { %256 = vmatpush3.bf16.xpose.msk.msra.mxu0 %vm355_vm1, %v251_v3 }
   0x6   :  { %259 = vmatprep.subr.msk.bf16.mxu0 %vm355_vm1, %v257_v6 }
   0x7   :  { %7 = vsyncpa [#allocation3], 0  ;;  %v263_v10 = vpack.c.bf16 %v19_v9, %v18_v8  ;;  %v20_v11 = vld [vmem:[%s451_s1 + $0x30] sm:$0xff]  ;;  %v21_v12 = vld [vmem:[%s451_s1 + $0x38] sm:$0xff]  ;;  %s326_s17 = smov [#allocation2]  }
   0x8   :  { %v269_v13 = vpack.c.bf16 %v21_v12, %v20_v11  ;;  %v22_v14 = vld [vmem:[%s451_s1 + $0x40] sm:$0xff]  ;;  %v23_v15 = vld [vmem:[%s451_s1 + $0x48] sm:$0xff]  ;;  %v24_v17 = vld [vmem:[%s451_s1 + $0x50] sm:$0xff]  ;;  %s169_s18 = sshll.u32 %s326_s17, 4  ;;  %s170_s18 = int_to_ptr.vmem [resolvable:$true] %s169_s18 }
   0x9   :  { %v275_v16 = vpack.c.bf16 %v23_v15, %v22_v14  ;;  %v25_v18 = vld [vmem:[%s451_s1 + $0x58] sm:$0xff]  ;;  %v26_v20 = vld [vmem:[%s451_s1 + $0x60] sm:$0xff]  ;;  %v27_v21 = vld [vmem:[%s451_s1 + $0x68] sm:$0xff]  ;;  %p307_p1 = scmp.lt.s32.totalorder %s170_s18, %s170_s18 }
   0xa   :  { %v281_v19 = vpack.c.bf16 %v25_v18, %v24_v17  ;;  %v287_v22 = vpack.c.bf16 %v27_v21, %v26_v20  ;;  %v28_v23 = vld [vmem:[%s451_s1 + $0x70] sm:$0xff]  ;;  %v29_v24 = vld [vmem:[%s451_s1 + $0x78] sm:$0xff]  ;;  %v13_v26 = vld [vmem:[%s450_s0 + $0x8] sm:$0xff]  ;;  %s302_s1 = scalar_lea.vmem %s170_s18, 256 }
   0xb   :  { %v293_v25 = vpack.c.bf16 %v29_v24, %v28_v23  ;;  %p303_p0 = scmp.ne.s32.totalorder %s170_s18, %s302_s1  ;;  %p308_p2 = scmp.lt.s32.totalorder %s302_s1, %s302_s1 }
   0xd   :  { %262 = vmatpush3.bf16.xpose.msk.msra.mxu0 %vm355_vm1, %v257_v6  ;;  %p309_p3 = por %p308_p2, %p307_p1 }
   0xe   :  { %265 = vmatprep.subr.msk.bf16.mxu0 %vm355_vm1, %v263_v10 }
   0xf   :  { %p310_p4 = pnand %p309_p3, %p303_p0 }
  0x15   :  { %268 = vmatpush3.bf16.xpose.msk.msra.mxu0 %vm355_vm1, %v263_v10 }
  0x16   :  { %271 = vmatprep.subr.msk.bf16.mxu0 %vm355_vm1, %v269_v13 }
  0x1d   :  { %274 = vmatpush3.bf16.xpose.msk.msra.mxu0 %vm355_vm1, %v269_v13 }
  0x1e   :  { %277 = vmatprep.subr.msk.bf16.mxu0 %vm355_vm1, %v275_v16 }
  0x25   :  { %280 = vmatpush3.bf16.xpose.msk.msra.mxu0 %vm355_vm1, %v275_v16 }
  0x26   :  { %283 = vmatprep.subr.msk.bf16.mxu0 %vm355_vm1, %v281_v19 }
  0x2d   :  { %286 = vmatpush3.bf16.xpose.msk.msra.mxu0 %vm355_vm1, %v281_v19 }
  0x2e   :  { %289 = vmatprep.subr.msk.bf16.mxu0 %vm355_vm1, %v287_v22 }
  0x35   :  { %292 = vmatpush3.bf16.xpose.msk.msra.mxu0 %vm355_vm1, %v287_v22 }
  0x36   :  { %295 = vmatprep.subr.msk.bf16.mxu0 %vm355_vm1, %v293_v25 }
  0x3d   :  { %298 = vmatpush3.bf16.xpose.msk.msra.mxu0 %vm355_vm1, %v293_v25 }
  0x44   :  { %249 = vmatmul.mubr.msk.f32.vlgmr.msra.gmra.mrb[0].mxu0 %vm30_vm0, %v13_v26 }
 0x117   :  { %v250_v27 = vpop.f32.mrb[0].mxu0 }
 0x118   :  { %v161_v28 = vmax.f32 %v250_v27, 0.0  ;;  %v151_v29 = vpop.f32.mrb[1].mxu0 }
 0x119   :  { %v160_v30 = vmax.f32 %v151_v29, 0.0 }
 0x11a   :  { %163 = vst [vmem:[#allocation2 + $0x8] sm:$0xff] %v161_v28 }
 0x11b   :  { %162 = vst [vmem:[#allocation2] sm:$0xff] %v160_v30 }
 0x11c   :  { %313 = shalt.err (!%p310_p4)
}
 0x11d   :  { %s314_s20 = scalar_lea.hbm %s452_s2, 256 }
 0x11e   :  { %p315_p5 = scmp.ne.s32.totalorder %s452_s2, %s314_s20  ;;  %p318_p6 = scmp.lt.u32.totalorder %s314_s20, %s452_s2 }
 0x120   :  { %p320_p7 = pnand %p318_p6, %p315_p5 }
 0x122   :  { %323 = shalt.err (!%p320_p7)
}
 0x123   :  { %s327_s25 = smov 128   ;;  %s328_s26 = smov 8  }
 0x124   :  { %175 = dma.vmem_to_hbm [thread:$0]  %s170_s18, 256, %s452_s2, [#allocation3], %s327_s25, %s327_s25, %s328_s26  }
 0x125   :  { %324 = dma.done.wait [#allocation3], 256  }
 0x126   :  { %325 = vsyncadd [#allocation3], 4294967040 }
 0x127   :  { %179 = vsyncpa [#allocation3], 1 }

</bundles_post_ra>
